<compile_context>
chip_gen: v7x
topology: tpu7x:2x2x1
jax: 0.10.0
libtpu: 0.0.40
codegen_flags: <defaults>
</compile_context>

<pallas_src>
import numpy as np
import jax
import jax.numpy as jnp
from jax import lax
from jax.experimental import pallas as pl
from jax.experimental.pallas import tpu as pltpu

_LANES = 128              # TPU vreg lane width
_MAX_BLOCK_ROWS = 8192    # 4 MiB input / 8 MiB output per block
_SINGLE_BLOCK_ROWS = 1024 # below this, one grid step; above, force >=2 (v7x megacore)
_VMEM_LIMIT_BYTES = 40 * 1024 * 1024  # covers 2x double-buffered blocks + const matrix

# Constant spreading matrix S = pf - pc : S[j, 2j] = -1, S[j, 2j+1] = +1.
# gate[:, 2j]   = 1 + fine_j * (-1) = coarse_j
# gate[:, 2j+1] = 0 + fine_j * (+1) = fine_j
_SPREAD_NP = np.zeros((_LANES, 2 * _LANES), np.float32)
_SPREAD_NP[np.arange(_LANES), 2 * np.arange(_LANES)] = -1.0
_SPREAD_NP[np.arange(_LANES), 2 * np.arange(_LANES) + 1] = 1.0


def _router_kernel(thr_ref, ent_ref, spread_ref, gate_ref):
    """Per-block gate computation with the coarse/fine interleave fused in.

    thr_ref   : (1,) f32 threshold in SMEM.
    ent_ref   : (TR, 128) f32 entropy block in VMEM.
    spread_ref: (128, 256) bf16 constant spreading matrix (block index fixed).
    gate_ref  : (TR, 256) f32 output; even lanes = coarse, odd lanes = fine.
    """
    t = thr_ref[0]
    # Compare in f32 (matches reference); the 0/1 result is exact in bf16.
    fine = (ent_ref[...] > t).astype(jnp.bfloat16)

    # Even-lane mask (1.0 on coarse slots), broadcast over rows.  Tiny (1, 256)
    # iota per step -- negligible VPU work.
    lane = lax.broadcasted_iota(jnp.int32, (1, 2 * _LANES), 1)
    even = ((lane & 1) == 0).astype(jnp.float32)

    # Single bf16 MXU matmul + broadcast add; exact (one nonzero term / lane).
    gate_ref[...] = even + jnp.dot(
        fine, spread_ref[...], preferred_element_type=jnp.float32)


def dual_grain_dynamic_entropy_router(h_coarse, h_fine, entropy, threshold):
    """JAX/Pallas equivalent of DualGrainDynamicEntropyRouter.forward.

    h_coarse / h_fine are unused by the reference forward.  `threshold` is the
    dynamically-sampled scalar (float32 array of shape (1,)), mirroring the
    host-side np.random.uniform in the PyTorch module.
    Returns gate of shape entropy.shape + (2,), float32.
    """
    del h_coarse, h_fine  # not used by the reference forward
    orig_shape = entropy.shape
    total = int(np.prod(orig_shape))

    # Lane-dense 2-D view: (rows, 128).  Only the sub-128 tail is ever padded.
    rows = -(-total // _LANES)
    pad = rows * _LANES - total

    # NOTE: compare happens in f32; entropy is expected to be float32 (as in
    # the reference usage).
    e_flat = jnp.ravel(entropy).astype(jnp.float32)
    if pad:
        e_flat = jnp.pad(e_flat, (0, pad))
    e2d = e_flat.reshape(rows, _LANES)

    # Block-row selection:
    #  - tiny inputs: one full-array block (block == full dims, (8,128) rule ok)
    #  - otherwise: at least 2 blocks (v7x megacore), capped at _MAX_BLOCK_ROWS,
    #    rounded up to a sublane multiple of 8.  Ragged last block is clamped
    #    by Pallas (OOB reads harmless, OOB writes dropped).
    if rows <= _SINGLE_BLOCK_ROWS:
        block_rows = rows
    else:
        half = -(-rows // 2)
        block_rows = min(_MAX_BLOCK_ROWS, -(-half // 8) * 8)
    grid = pl.cdiv(rows, block_rows)

    thr = jnp.asarray(threshold, jnp.float32).reshape(1)
    spread = jnp.asarray(_SPREAD_NP, dtype=jnp.bfloat16)

    gate2d = pl.pallas_call(
        _router_kernel,
        out_shape=jax.ShapeDtypeStruct((rows, 2 * _LANES), jnp.float32),
        grid_spec=pltpu.PrefetchScalarGridSpec(
            num_scalar_prefetch=0,
            grid=(grid,),
            in_specs=[
                pl.BlockSpec(memory_space=pltpu.MemorySpace.SMEM),       # threshold
                pl.BlockSpec((block_rows, _LANES), lambda r: (r, 0)),    # entropy
                pl.BlockSpec((_LANES, 2 * _LANES), lambda r: (0, 0)),    # const matrix
            ],
            out_specs=pl.BlockSpec((block_rows, 2 * _LANES), lambda r: (r, 0)),
        ),
        compiler_params=pltpu.CompilerParams(
            dimension_semantics=("parallel",),   # shards row-tiles across v7x TCs
            vmem_limit_bytes=_VMEM_LIMIT_BYTES),
    )(thr, e2d, spread)

    gate_flat = gate2d.reshape(-1)
    if pad:
        gate_flat = gate_flat[: 2 * total]
    # Even/odd lanes already match cat([coarse, fine], dim=-1): this reshape is
    # a free contiguous view, no extra HBM traffic.
    return gate_flat.reshape(*orig_shape, 2)


if __name__ == "__main__":
    B, C, H, W = 2, 4, 16, 16
    fine_grain_ratio_min, fine_grain_ratio_max = 0.01, 0.99

    key = jax.random.PRNGKey(0)
    k1, k2, k3, k4 = jax.random.split(key, 4)

    # NCHW feature maps (unused by forward, kept for interface fidelity)
    h_coarse = jax.random.normal(k2, (B, C, H // 2, W // 2), dtype=jnp.float32)
    h_fine = jax.random.normal(k3, (B, C, H, W), dtype=jnp.float32)
    entropy = jax.random.uniform(k1, (B, H, W), dtype=jnp.float32)

    # Dynamic threshold (mirrors np.random.uniform in the PyTorch forward,
    # sampled with a fixed key for reproducibility).
    # TODO(synk): host-side np.random.uniform has no in-kernel equivalent; the
    # threshold is sampled outside and passed in as a scalar input.
    threshold = jax.random.uniform(
        k4, (1,), dtype=jnp.float32,
        minval=fine_grain_ratio_min, maxval=fine_grain_ratio_max)

    gate = dual_grain_dynamic_entropy_router(h_coarse, h_fine, entropy, threshold)
    gate = jax.block_until_ready(gate)

    # Pure-JAX reference check (values are exactly 0.0 / 1.0).
    t = threshold[0]
    ref = jnp.stack([(entropy <= t).astype(jnp.float32),
                     (entropy > t).astype(jnp.float32)], axis=-1)
    assert gate.shape == (B, H, W, 2)
    assert gate.dtype == jnp.float32
    np.testing.assert_array_equal(np.asarray(gate), np.asarray(ref))

    print("KERNEL_OK")
</pallas_src>

<mosaic_0001>
module attributes {stable_mosaic.version = 11 : i64} {
  func.func @_router_kernel(%arg0: i32, %arg1: memref<1xf32, #tpu.memory_space<smem>>, %arg2: memref<4x128xf32, #tpu.memory_space<vmem>>, %arg3: memref<128x256xbf16, #tpu.memory_space<vmem>>, %arg4: memref<4x256xf32, #tpu.memory_space<vmem>>) attributes {dimension_semantics = [#tpu.dimension_semantics<parallel>], iteration_bounds = array<i64: 1>, scalar_prefetch = 0 : i64, scratch_operands = 0 : i64, tpu.core_type = #tpu.core_type<tc>, window_params = [{transform_indices = @transform_0, window_bounds = array<i64: 1>}, {transform_indices = @transform_1, window_bounds = array<i64: 4, 128>}, {pipeline_mode = #tpu.pipeline_mode<synchronous>, transform_indices = @transform_2, window_bounds = array<i64: 128, 256>}, {transform_indices = @transform_3, window_bounds = array<i64: 4, 256>}]} {
    %c0 = arith.constant 0 : index
    %0 = memref.load %arg1[%c0] : memref<1xf32, #tpu.memory_space<smem>>
    %c0_0 = arith.constant 0 : index
    %c0_1 = arith.constant 0 : index
    %1 = vector.load %arg2[%c0_0, %c0_1] : memref<4x128xf32, #tpu.memory_space<vmem>>, vector<4x128xf32>
    %2 = vector.broadcast %0 : f32 to vector<4x128xf32>
    %3 = arith.cmpf ogt, %1, %2 : vector<4x128xf32>
    %4 = arith.extui %3 : vector<4x128xi1> to vector<4x128xi32>
    %5 = arith.sitofp %4 : vector<4x128xi32> to vector<4x128xf32>
    %6 = arith.truncf %5 : vector<4x128xf32> to vector<4x128xbf16>
    %7 = tpu.iota {dimensions = array<i32: 1>} : vector<1x256xi32>
    %c1_i32 = arith.constant 1 : i32
    %8 = vector.broadcast %c1_i32 : i32 to vector<1x256xi32>
    %9 = arith.andi %7, %8 : vector<1x256xi32>
    %c0_i32 = arith.constant 0 : i32
    %10 = vector.broadcast %c0_i32 : i32 to vector<1x256xi32>
    %11 = arith.cmpi eq, %9, %10 : vector<1x256xi32>
    %12 = arith.extui %11 : vector<1x256xi1> to vector<1x256xi32>
    %13 = arith.sitofp %12 : vector<1x256xi32> to vector<1x256xf32>
    %c0_2 = arith.constant 0 : index
    %c0_3 = arith.constant 0 : index
    %14 = vector.load %arg3[%c0_2, %c0_3] : memref<128x256xbf16, #tpu.memory_space<vmem>>, vector<128x256xbf16>
    %cst = arith.constant dense<0.000000e+00> : vector<4x256xf32>
    %15 = tpu.matmul %6, %14, %cst {dimension_numbers = #tpu.dot_dimension_numbers<[1], [0], [0], [1], [0, 0, 1, 1], [], []>} : vector<4x128xbf16>, vector<128x256xbf16>, vector<4x256xf32> -> vector<4x256xf32>
    %16 = vector.broadcast %13 : vector<1x256xf32> to vector<4x256xf32>
    %17 = arith.addf %16, %15 : vector<4x256xf32>
    %c0_4 = arith.constant 0 : index
    %c0_5 = arith.constant 0 : index
    %18 = vector.load %arg4[%c0_4, %c0_5] : memref<4x256xf32, #tpu.memory_space<vmem>>, vector<4x256xf32>
    tpu.vector_store %arg4[%c0_4, %c0_5], %17 {strides = array<i32>} : memref<4x256xf32, #tpu.memory_space<vmem>>, vector<4x256xf32>,
    return
  }
  func.func @transform_0(%arg0: i32) -> i32 {
    %c0_i32 = arith.constant 0 : i32
    %c0_i32_0 = arith.constant 0 : i32
    return %c0_i32 : i32
  }
  func.func @transform_1(%arg0: i32) -> (i32, i32) {
    %c0_i32 = arith.constant 0 : i32
    %c0_i32_0 = arith.constant 0 : i32
    return %arg0, %c0_i32 : i32, i32
  }
  func.func @transform_2(%arg0: i32) -> (i32, i32) {
    %c0_i32 = arith.constant 0 : i32
    %c0_i32_0 = arith.constant 0 : i32
    %c0_i32_1 = arith.constant 0 : i32
    return %c0_i32, %c0_i32_0 : i32, i32
  }
  func.func @transform_3(%arg0: i32) -> (i32, i32) {
    %c0_i32 = arith.constant 0 : i32
    %c0_i32_0 = arith.constant 0 : i32
    return %arg0, %c0_i32 : i32, i32
  }
}

</mosaic_0001>

<bundles_post_ra>
// kernel: tpu_custom_call.1
= control target key start
LH: loop header
LB: loop body
LE: loop exit
PB: predicated region body
PF: predicated region fallthrough
CT: control target
= control target key end

     0   :  { %9 = vsyncpa [#allocation4], 0  ;;  %s420_s0 = inlined_call_operand.<no memory space> [shape: f32[1], index: 0, kind: input, shape index: {}]   ;;  %s421_s1 = inlined_call_operand.hbm [shape: f32[4,128], index: 1, kind: input, shape index: {}]   ;;  %s422_s2 = inlined_call_operand.hbm [shape: bf16[128,256], index: 2, kind: input, shape index: {}]   ;;  %s423_s3 = inlined_call_operand.hbm [shape: f32[4,256], index: 3, kind: output, shape index: {}]  }
   0x1   :  { %10 = vsyncpa [#allocation7], 0 }
   0x2   :  { %11 = vsyncpa [#allocation5], 0  ;;  %s346_s12 = smov [#allocation3]   ;;  %s347_s14 = smov [#allocation6]  }
   0x3   :  { %s20_s13 = sshll.u32 %s346_s12, 4  ;;  %s29_s15 = sshll.u32 %s347_s14, 4  ;;  %s21_s13 = int_to_ptr.vmem [resolvable:$true] %s20_s13  ;;  %s374_s15 = int_to_ptr.vmem [resolvable:$true] %s29_s15 }
   0x4   :  { %s274_s18 = scalar_lea.hbm %s421_s1, 64 }
   0x5   :  { %p275_p0 = scmp.ne.s32.totalorder %s421_s1, %s274_s18  ;;  %p278_p1 = scmp.lt.u32.totalorder %s274_s18, %s421_s1 }
   0x7   :  { %p280_p2 = pnand %p278_p1, %p275_p0 }
   0x9   :  { %283 = shalt.err (!%p280_p2)
}
   0xa   :  { %s284_s23 = scalar_lea.vmem %s21_s13, 64  ;;  %p289_p4 = scmp.lt.s32.totalorder %s21_s13, %s21_s13 }
   0xb   :  { %p285_p3 = scmp.ne.s32.totalorder %s21_s13, %s284_s23  ;;  %p290_p5 = scmp.lt.s32.totalorder %s284_s23, %s284_s23 }
   0xd   :  { %p291_p6 = por %p290_p5, %p289_p4 }
   0xf   :  { %p292_p7 = pnand %p291_p6, %p285_p3 }
  0x11   :  { %295 = shalt.err (!%p292_p7)
}
  0x12   :  { %23 = dma.hbm_to_vmem [thread:$0]  %s421_s1, 64, %s21_s13, [#allocation4]  }
  0x13   :  { %s296_s28 = scalar_lea.hbm %s422_s2, 2048 }
  0x14   :  { %p297_p8 = scmp.ne.s32.totalorder %s422_s2, %s296_s28  ;;  %p300_p9 = scmp.lt.u32.totalorder %s296_s28, %s422_s2 }
  0x16   :  { %p302_p10 = pnand %p300_p9, %p297_p8 }
  0x18   :  { %305 = shalt.err (!%p302_p10)
}
  0x19   :  { %s306_s6 = scalar_lea.vmem %s374_s15, 2048  ;;  %p311_p12 = scmp.lt.s32.totalorder %s374_s15, %s374_s15 }
  0x1a   :  { %p307_p11 = scmp.ne.s32.totalorder %s374_s15, %s306_s6  ;;  %p312_p13 = scmp.lt.s32.totalorder %s306_s6, %s306_s6 }
  0x1c   :  { %p313_p0 = por %p312_p13, %p311_p12 }
  0x1e   :  { %p314_p1 = pnand %p313_p0, %p307_p11 }
  0x20   :  { %317 = shalt.err (!%p314_p1)
}
  0x21   :  { %s348_s1 = smov 128   ;;  %s349_s7 = smov 8  }
  0x22   :  { %35 = dma.hbm_to_vmem [thread:$0]  %s422_s2, 2048, %s374_s15, [#allocation7], %s348_s1, %s348_s1, %s349_s7  }
  0x23   :  { %340 = dma.done.wait [#allocation4], 64  }
  0x24   :  { %341 = vsyncadd [#allocation4], 4294967232 }
  0x25   :  { %342 = dma.done.wait [#allocation7], 2048  }
  0x26   :  { %343 = vsyncadd [#allocation7], 4294965248  ;;  %v350_v0 = vmov 0   ;;  %v250_v1 = vld [vmem:[#allocation6 + $0x4] ss:$8 sps:$4 sm:$0xff]   ;;  %v45_v17 = vstv %s420_s0  ;;  %v50_v20 = vlaneseq  ;;  %v352_v25 = vmov 0.0  }
  0x27   :  { %189 = vmatprep.mubr.bf16.mxu0 %v350_v0  ;;  %v252_v2 = vld [vmem:[#allocation6] ss:$8 sps:$4 sm:$0xff]   ;;  %157 = vmatprep.subr.bf16.mxu0 %v250_v1  ;;  %v253_v3 = vld [vmem:[#allocation6 + $0x14] ss:$8 sps:$4 sm:$0xff]   ;;  %v255_v4 = vld [vmem:[#allocation6 + $0x10] ss:$8 sps:$4 sm:$0xff]  }
  0x28   :  { %158 = vmatpush1.bf16.msra.mxu0 %v252_v2  ;;  %v256_v5 = vld [vmem:[#allocation6 + $0x24] ss:$8 sps:$4 sm:$0xff]   ;;  %v258_v6 = vld [vmem:[#allocation6 + $0x20] ss:$8 sps:$4 sm:$0xff]   ;;  %v259_v7 = vld [vmem:[#allocation6 + $0x34] ss:$8 sps:$4 sm:$0xff]  }
  0x29   :  { %159 = vmatprep.subr.bf16.mxu0 %v253_v3  ;;  %v261_v8 = vld [vmem:[#allocation6 + $0x30] ss:$8 sps:$4 sm:$0xff]   ;;  %v262_v9 = vld [vmem:[#allocation6 + $0x44] ss:$8 sps:$4 sm:$0xff]   ;;  %v264_v10 = vld [vmem:[#allocation6 + $0x40] ss:$8 sps:$4 sm:$0xff]  }
  0x2a   :  { %v265_v11 = vld [vmem:[#allocation6 + $0x54] ss:$8 sps:$4 sm:$0xff]   ;;  %v267_v12 = vld [vmem:[#allocation6 + $0x50] ss:$8 sps:$4 sm:$0xff]   ;;  %v268_v13 = vld [vmem:[#allocation6 + $0x64] ss:$8 sps:$4 sm:$0xff]  }
  0x2b   :  { %v270_v14 = vld [vmem:[#allocation6 + $0x60] ss:$8 sps:$4 sm:$0xff]   ;;  %v271_v15 = vld [vmem:[#allocation6 + $0x74] ss:$8 sps:$4 sm:$0xff]   ;;  %v273_v18 = vld [vmem:[#allocation6 + $0x70] ss:$8 sps:$4 sm:$0xff]  }
  0x2c   :  { %160 = vmatpush1.bf16.msra.mxu0 %v255_v4  ;;  %v44_v16 = vld [vmem:[#allocation3] sm:$0xf]  ;;  %v351_v19 = vmov 1.0|1.0   ;;  %v51_v21 = vand.u32 127, %v50_v20  ;;  %s353_s0 = smov [#allocation8]  }
  0x2d   :  { %161 = vmatprep.subr.bf16.mxu0 %v256_v5  ;;  %vm46_vm0 = vcmp.gt.f32.partialorder %v44_v16, %v45_v17  ;;  %s211_s11 = sshll.u32 %s353_s0, 4  ;;  %s212_s11 = int_to_ptr.vmem [resolvable:$true] %s211_s11 }
  0x2e   :  { %vm240_vm1 = vmpackc.low %vm46_vm0, %vm46_vm0  ;;  %v52_v22 = vadd.s32 128, %v51_v21  ;;  %v53_v23 = vand.u32 1, %v51_v21  ;;  %s318_s12 = scalar_lea.vmem %s212_s11, 128  ;;  %p323_p3 = scmp.lt.s32.totalorder %s212_s11, %s212_s11 }
  0x2f   :  { %p319_p2 = scmp.ne.s32.totalorder %s212_s11, %s318_s12  ;;  %p324_p4 = scmp.lt.s32.totalorder %s318_s12, %s318_s12 }
  0x30   :  { %162 = vmatpush1.bf16.msra.mxu0 %v258_v6  ;;  %v54_v24 = vand.u32 1, %v52_v22  ;;  %vm55_vm2 = vcmp.eq.s32.totalorder %v53_v23, 0 }
  0x31   :  { %163 = vmatprep.subr.bf16.mxu0 %v259_v7  ;;  %v222_v26 = vsel %vm55_vm2, 1.0, %v352_v25  ;;  %p325_p5 = por %p324_p4, %p323_p3 }
  0x32   :  { %vm56_vm3 = vcmp.eq.s32.totalorder %v54_v24, 0 }
  0x33   :  { %v223_v27 = vsel %vm56_vm3, 1.0, %v352_v25  ;;  %p326_p6 = pnand %p325_p5, %p319_p2 }
  0x34   :  { %164 = vmatpush1.bf16.msra.mxu0 %v261_v8 }
  0x35   :  { %165 = vmatprep.subr.bf16.mxu0 %v262_v9 }
  0x38   :  { %166 = vmatpush1.bf16.msra.mxu0 %v264_v10 }
  0x39   :  { %167 = vmatprep.subr.bf16.mxu0 %v265_v11 }
  0x3c   :  { %168 = vmatpush1.bf16.msra.mxu0 %v267_v12 }
  0x3d   :  { %169 = vmatprep.subr.bf16.mxu0 %v268_v13 }
  0x40   :  { %170 = vmatpush1.bf16.msra.mxu0 %v270_v14 }
  0x41   :  { %171 = vmatprep.subr.bf16.mxu0 %v271_v15 }
  0x44   :  { %172 = vmatpush1.bf16.msra.mxu0 %v273_v18 }
  0x47   :  { %241 = vmatmul.mubr.msk.bf16.vlgmr.msra.gmra.mrb[0].mxu0 %vm240_vm1, %v351_v19 }
 0x11a   :  { %v191_v28 = vpop.f32.mrb[0].mxu0 }
 0x11b   :  { %v198_v29 = vadd.f32 %v222_v26, %v191_v28  ;;  %v193_v30 = vpop.f32.mrb[1].mxu0 }
 0x11c   :  { %v199_v31 = vadd.f32 %v223_v27, %v193_v30  ;;  %v195_v32 = vpop.f32.mrb[2].mxu0 }
 0x11d   :  { %v196_v33 = vpop.f32.mrb[3].mxu0 }
 0x11e   :  { %v202_v34 = vcombine.low %v198_v29, %v199_v31 }
 0x120   :  { %204 = vst [vmem:[#allocation8] sm:$0xff] %v202_v34 }
 0x121   :  { %329 = shalt.err (!%p326_p6)
}
 0x122   :  { %s330_s15 = scalar_lea.hbm %s423_s3, 128 }
 0x123   :  { %p331_p7 = scmp.ne.s32.totalorder %s423_s3, %s330_s15  ;;  %p334_p8 = scmp.lt.u32.totalorder %s330_s15, %s423_s3 }
 0x125   :  { %p336_p9 = pnand %p334_p8, %p331_p7 }
 0x127   :  { %339 = shalt.err (!%p336_p9)
}
 0x128   :  { %214 = dma.vmem_to_hbm [thread:$0]  %s212_s11, 128, %s423_s3, [#allocation5]  }
 0x129   :  { %344 = dma.done.wait [#allocation5], 128  }
 0x12a   :  { %345 = vsyncadd [#allocation5], 4294967168 }
 0x12b   :  { %218 = vsyncpa [#allocation4], 1 }
 0x12c   :  { %219 = vsyncpa [#allocation7], 1 }
 0x12d   :  { %220 = vsyncpa [#allocation5], 1 }

</bundles_post_ra>
